<compile_context>
chip_gen: v7x
topology: tpu7x:2x2x1
jax: 0.10.0
libtpu: 0.0.40
codegen_flags: <defaults>
</compile_context>

<pallas_src>
import jax
import jax.numpy as jnp
from jax.experimental import pallas as pl
from jax.experimental.pallas import tpu as pltpu

BN_EPS = 1e-5


# ----------------------------------------------------------------------------
# Kernels
# ----------------------------------------------------------------------------
def _single_block_kernel(x_ref, w1_ref, gb_ref, w2_ref, b2_ref, o_ref):
    """Whole problem resident in VMEM: dense1 -> BN -> ReLU -> dense2 in one shot."""
    # dense1 (bias dropped: it cancels exactly under batch-mean subtraction).
    h = jnp.dot(x_ref[...], w1_ref[...], preferred_element_type=jnp.float32)

    # BatchNorm1d, training-mode batch statistics (biased variance).
    mean = jnp.mean(h, axis=0, keepdims=True)            # (1, H)
    c = h - mean
    var = jnp.mean(c * c, axis=0, keepdims=True)          # (1, H), two-pass
    scale = gb_ref[0:1, :] * jax.lax.rsqrt(var + BN_EPS)  # gamma / sqrt(var+eps)

    # ReLU, then dense2.
    a = jnp.maximum(c * scale + gb_ref[1:2, :], 0.0).astype(jnp.bfloat16)
    o_ref[...] = (jnp.dot(a, w2_ref[...], preferred_element_type=jnp.float32)
                  + b2_ref[...]).astype(o_ref.dtype)


def _tiled_kernel(x_ref, w1_ref, gb_ref, w2_ref, b2_ref, o_ref):
    """1-D grid over the hidden axis H; accumulate dense2 partial sums into o_ref.

    BN statistics are per-feature over the full (resident) batch, so per-H-tile
    stats are exact.
    """
    k = pl.program_id(0)
    nk = pl.num_programs(0)
    t_h = w1_ref.shape[1]

    @pl.when(k == 0)
    def _init():
        o_ref[...] = jnp.zeros_like(o_ref)

    # dense1 on this H tile: (B, D)bf16 @ (D, tH)bf16 -> f32.
    h = jnp.dot(x_ref[...], w1_ref[...], preferred_element_type=jnp.float32)

    mean = jnp.mean(h, axis=0, keepdims=True)
    c = h - mean
    var = jnp.mean(c * c, axis=0, keepdims=True)

    start = pl.multiple_of(k * t_h, t_h)
    gb = gb_ref[:, pl.ds(start, t_h)]                      # (2, tH) resident slice
    scale = gb[0:1, :] * jax.lax.rsqrt(var + BN_EPS)
    a = jnp.maximum(c * scale + gb[1:2, :], 0.0).astype(jnp.bfloat16)

    # dense2 partial sum directly into the resident f32 output tile.
    o_ref[...] += jnp.dot(a, w2_ref[...], preferred_element_type=jnp.float32)

    @pl.when(k == nk - 1)
    def _finalize():
        o_ref[...] += b2_ref[...]


# ----------------------------------------------------------------------------
# Sizing helpers
# ----------------------------------------------------------------------------
def _vmem_budget_bytes():
    """~75% of this generation's VMEM (64 MiB on v7x, 128 MiB on v5e/v6e)."""
    try:
        cap = pltpu.get_tpu_info().vmem_capacity_bytes
    except Exception:
        cap = 64 * 1024 * 1024  # conservative fallback (v7x per-TC capacity)
    return min(int(cap * 3 // 4), 100 * 1024 * 1024)


def _single_block_bytes(B, D, H):
    return (B * D * 2              # x (bf16)
            + 2 * D * H * 2        # w1 + w2 (bf16)
            + 2 * H * 4 + D * 4    # gamma/beta + b2 (f32)
            + B * D * 4            # output (f32)
            + 2 * B * H * 4)       # f32 dense1 activation working set (margin)


def _tiled_bytes(B, D, H, t_h):
    return (2 * B * D * 2          # x (resident, safety x2)
            + 2 * D * t_h * 2      # w1 tile, double-buffered
            + 2 * t_h * D * 2      # w2 tile, double-buffered
            + 2 * H * 4 + D * 4    # gamma/beta + b2 (resident)
            + B * D * 4            # output accumulator (resident)
            + 2 * B * t_h * 4)     # f32 dense1 activation working set


def _pick_tile_h(B, D, H, budget):
    for c in (4096, 2048, 1024, 512, 256, 128):
        if c <= H and H % c == 0 and _tiled_bytes(B, D, H, c) <= budget:
            return c
    return 128 if H % 128 == 0 else H


# ----------------------------------------------------------------------------
# Wrapper
# ----------------------------------------------------------------------------
def projection2(x, w1, b1, gamma, beta, w2, b2, *, force_tile_h=None):
    """Projection2 forward. x: (B, D) f32. Weights in PyTorch-transposed layout:
    w1: (D, 2D), w2: (2D, D). Returns (B, D) f32.

    b1 is accepted for API parity but is mathematically cancelled by the
    training-mode BatchNorm mean subtraction, so it is not streamed to the kernel.
    """
    del b1
    B, D = x.shape
    H = w1.shape[1]
    assert w1.shape == (D, H) and w2.shape == (H, D)

    x_bf = x.astype(jnp.bfloat16)
    w1_bf = w1.astype(jnp.bfloat16)
    w2_bf = w2.astype(jnp.bfloat16)
    gb = jnp.stack([gamma.astype(jnp.float32), beta.astype(jnp.float32)], 0)  # (2, H)
    b2_r = b2.reshape(1, D).astype(jnp.float32)

    budget = _vmem_budget_bytes()
    flops = 4 * B * D * H + 10 * B * H
    bytes_accessed = (B * D * 2 + 2 * D * H * 2 + 2 * H * 4 + D * 4 + B * D * 4)
    cost = pl.CostEstimate(flops=flops, transcendentals=H,
                           bytes_accessed=bytes_accessed)

    # ---- Fast path: everything fits in VMEM -> gridless single invocation ----
    if force_tile_h is None and _single_block_bytes(B, D, H) <= budget:
        return pl.pallas_call(
            _single_block_kernel,
            out_shape=jax.ShapeDtypeStruct((B, D), jnp.float32),
            compiler_params=pltpu.CompilerParams(vmem_limit_bytes=budget),
            cost_estimate=cost,
        )(x_bf, w1_bf, gb, w2_bf, b2_r)

    # ---- Tiled path: stream weight tiles along the H reduction axis ----
    t_h = force_tile_h if force_tile_h is not None else _pick_tile_h(B, D, H, budget)
    assert H % t_h == 0

    return pl.pallas_call(
        _tiled_kernel,
        out_shape=jax.ShapeDtypeStruct((B, D), jnp.float32),
        grid_spec=pltpu.PrefetchScalarGridSpec(
            num_scalar_prefetch=0,
            grid=(H // t_h,),
            in_specs=[
                pl.BlockSpec((B, D), lambda k: (0, 0)),     # x (resident)
                pl.BlockSpec((D, t_h), lambda k: (0, k)),   # w1 column tile
                pl.BlockSpec((2, H), lambda k: (0, 0)),     # gamma/beta (resident)
                pl.BlockSpec((t_h, D), lambda k: (k, 0)),   # w2 row tile
                pl.BlockSpec((1, D), lambda k: (0, 0)),     # b2 (resident)
            ],
            out_specs=pl.BlockSpec((B, D), lambda k: (0, 0)),  # resident accumulator
        ),
        compiler_params=pltpu.CompilerParams(
            dimension_semantics=("arbitrary",),
            vmem_limit_bytes=budget,
        ),
        cost_estimate=cost,
    )(x_bf, w1_bf, gb, w2_bf, b2_r)


# ----------------------------------------------------------------------------
# Reference (pure JAX) and test
# ----------------------------------------------------------------------------
def reference(x, w1, b1, gamma, beta, w2, b2):
    h = x @ w1 + b1
    mean = h.mean(axis=0, keepdims=True)
    var = ((h - mean) ** 2).mean(axis=0, keepdims=True)  # biased (training mode)
    h = (h - mean) / jnp.sqrt(var + BN_EPS) * gamma + beta
    h = jnp.maximum(h, 0.0)
    return h @ w2 + b2


if __name__ == "__main__":
    # Module default output_dim=256 -> hidden 512; small batch of 8.
    B, D = 8, 256
    H = 2 * D

    key = jax.random.PRNGKey(0)
    kx, kw1, kb1, kw2, kb2 = jax.random.split(key, 5)

    x = jax.random.normal(kx, (B, D), dtype=jnp.float32)

    # Deterministic PyTorch-Linear-like init.
    lim1 = 1.0 / (D ** 0.5)
    w1 = jax.random.uniform(kw1, (D, H), jnp.float32, -lim1, lim1)
    b1 = jax.random.uniform(kb1, (H,), jnp.float32, -lim1, lim1)
    lim2 = 1.0 / (H ** 0.5)
    w2 = jax.random.uniform(kw2, (H, D), jnp.float32, -lim2, lim2)
    b2 = jax.random.uniform(kb2, (D,), jnp.float32, -lim2, lim2)
    # BatchNorm1d affine defaults: gamma=1, beta=0.
    gamma = jnp.ones((H,), jnp.float32)
    beta = jnp.zeros((H,), jnp.float32)

    ref = reference(x, w1, b1, gamma, beta, w2, b2)

    # Fast (single-block) path — the one selected for these shapes.
    out = jax.block_until_ready(projection2(x, w1, b1, gamma, beta, w2, b2))
    assert out.shape == (B, D)
    # bf16 MXU inputs with f32 accumulation -> loosened tolerance vs f32 reference.
    assert jnp.allclose(out, ref, atol=5e-2, rtol=5e-2), "single-block mismatch"

    # Also exercise the tiled fallback path (forced) to keep it verified.
    out_t = jax.block_until_ready(
        projection2(x, w1, b1, gamma, beta, w2, b2, force_tile_h=256))
    assert jnp.allclose(out_t, ref, atol=5e-2, rtol=5e-2), "tiled-path mismatch"

    print("KERNEL_OK")
</pallas_src>

<mosaic_0001>
module attributes {stable_mosaic.version = 11 : i64} {
  func.func @_single_block_kernel(%arg0: memref<8x256xbf16, #tpu.memory_space<vmem>>, %arg1: memref<256x512xbf16, #tpu.memory_space<vmem>>, %arg2: memref<2x512xf32, #tpu.memory_space<vmem>>, %arg3: memref<512x256xbf16, #tpu.memory_space<vmem>>, %arg4: memref<1x256xf32, #tpu.memory_space<vmem>>, %arg5: memref<8x256xf32, #tpu.memory_space<vmem>>) attributes {dimension_semantics = [], scalar_prefetch = 0 : i64, scratch_operands = 0 : i64, tpu.core_type = #tpu.core_type<tc>} {
    %c0 = arith.constant 0 : index
    %c0_0 = arith.constant 0 : index
    %0 = vector.load %arg0[%c0, %c0_0] : memref<8x256xbf16, #tpu.memory_space<vmem>>, vector<8x256xbf16>
    %c0_1 = arith.constant 0 : index
    %c0_2 = arith.constant 0 : index
    %1 = vector.load %arg1[%c0_1, %c0_2] : memref<256x512xbf16, #tpu.memory_space<vmem>>, vector<256x512xbf16>
    %cst = arith.constant dense<0.000000e+00> : vector<8x512xf32>
    %2 = tpu.matmul %0, %1, %cst {dimension_numbers = #tpu.dot_dimension_numbers<[1], [0], [0], [1], [0, 0, 1, 1], [], []>} : vector<8x256xbf16>, vector<256x512xbf16>, vector<8x512xf32> -> vector<8x512xf32>
    %cst_3 = arith.constant dense<0.000000e+00> : vector<512xf32>
    %3 = vector.multi_reduction <add>, %2, %cst_3 [0] : vector<8x512xf32> to vector<512xf32>
    %4 = vector.shape_cast %3 : vector<512xf32> to vector<1x512xf32>
    %cst_4 = arith.constant 8.000000e+00 : f32
    %5 = vector.broadcast %cst_4 : f32 to vector<1x512xf32>
    %6 = arith.divf %4, %5 : vector<1x512xf32>
    %7 = vector.broadcast %6 : vector<1x512xf32> to vector<8x512xf32>
    %8 = arith.subf %2, %7 : vector<8x512xf32>
    %9 = arith.mulf %8, %8 : vector<8x512xf32>
    %cst_5 = arith.constant dense<0.000000e+00> : vector<512xf32>
    %10 = vector.multi_reduction <add>, %9, %cst_5 [0] : vector<8x512xf32> to vector<512xf32>
    %11 = vector.shape_cast %10 : vector<512xf32> to vector<1x512xf32>
    %cst_6 = arith.constant 8.000000e+00 : f32
    %12 = vector.broadcast %cst_6 : f32 to vector<1x512xf32>
    %13 = arith.divf %11, %12 : vector<1x512xf32>
    %c0_7 = arith.constant 0 : index
    %c0_8 = arith.constant 0 : index
    %14 = vector.load %arg2[%c0_7, %c0_8] : memref<2x512xf32, #tpu.memory_space<vmem>>, vector<1x512xf32>
    %cst_9 = arith.constant 9.99999974E-6 : f32
    %15 = vector.broadcast %cst_9 : f32 to vector<1x512xf32>
    %16 = arith.addf %13, %15 : vector<1x512xf32>
    %17 = math.rsqrt %16 : vector<1x512xf32>
    %18 = arith.mulf %14, %17 : vector<1x512xf32>
    %19 = vector.broadcast %18 : vector<1x512xf32> to vector<8x512xf32>
    %20 = arith.mulf %8, %19 : vector<8x512xf32>
    %c1 = arith.constant 1 : index
    %c0_10 = arith.constant 0 : index
    %21 = vector.load %arg2[%c1, %c0_10] : memref<2x512xf32, #tpu.memory_space<vmem>>, vector<1x512xf32>
    %22 = vector.broadcast %21 : vector<1x512xf32> to vector<8x512xf32>
    %23 = arith.addf %20, %22 : vector<8x512xf32>
    %cst_11 = arith.constant 0.000000e+00 : f32
    %24 = vector.broadcast %cst_11 : f32 to vector<8x512xf32>
    %25 = arith.maximumf %23, %24 : vector<8x512xf32>
    %26 = arith.truncf %25 : vector<8x512xf32> to vector<8x512xbf16>
    %c0_12 = arith.constant 0 : index
    %c0_13 = arith.constant 0 : index
    %27 = vector.load %arg3[%c0_12, %c0_13] : memref<512x256xbf16, #tpu.memory_space<vmem>>, vector<512x256xbf16>
    %cst_14 = arith.constant dense<0.000000e+00> : vector<8x256xf32>
    %28 = tpu.matmul %26, %27, %cst_14 {dimension_numbers = #tpu.dot_dimension_numbers<[1], [0], [0], [1], [0, 0, 1, 1], [], []>} : vector<8x512xbf16>, vector<512x256xbf16>, vector<8x256xf32> -> vector<8x256xf32>
    %c0_15 = arith.constant 0 : index
    %c0_16 = arith.constant 0 : index
    %29 = vector.load %arg4[%c0_15, %c0_16] : memref<1x256xf32, #tpu.memory_space<vmem>>, vector<1x256xf32>
    %30 = vector.broadcast %29 : vector<1x256xf32> to vector<8x256xf32>
    %31 = arith.addf %28, %30 : vector<8x256xf32>
    %c0_17 = arith.constant 0 : index
    %c0_18 = arith.constant 0 : index
    %32 = vector.load %arg5[%c0_17, %c0_18] : memref<8x256xf32, #tpu.memory_space<vmem>>, vector<8x256xf32>
    tpu.vector_store %arg5[%c0_17, %c0_18], %31 {strides = array<i32>} : memref<8x256xf32, #tpu.memory_space<vmem>>, vector<8x256xf32>,
    return
  }
}

</mosaic_0001>

<bundles_post_ra>
// kernel: tpu_custom_call.1
= control target key start
LH: loop header
LB: loop body
LE: loop exit
PB: predicated region body
PF: predicated region fallthrough
CT: control target
= control target key end

     0   :  { %10 = vsyncpa [#allocation3], 0  ;;  %s1803_s0 = inlined_call_operand.hbm [shape: bf16[8,256], index: 0, kind: input, shape index: {}]   ;;  %s1804_s1 = inlined_call_operand.hbm [shape: bf16[256,512], index: 1, kind: input, shape index: {}]   ;;  %s1805_s2 = inlined_call_operand.hbm [shape: f32[2,512], index: 2, kind: input, shape index: {}]   ;;  %s1806_s3 = inlined_call_operand.hbm [shape: bf16[512,256], index: 3, kind: input, shape index: {}]   ;;  %s1807_s4 = inlined_call_operand.vmem [shape: f32[1,256], index: 4, kind: input, shape index: {}]   ;;  %s1808_s5 = inlined_call_operand.hbm [shape: f32[8,256], index: 5, kind: output, shape index: {}]  }
   0x1   :  { %11 = vsyncpa [#allocation6], 0 }
   0x2   :  { %12 = vsyncpa [#allocation9], 0 }
   0x3   :  { %13 = vsyncpa [#allocation4], 0  ;;  %s1673_s18 = smov [#allocation5]   ;;  %s1555_s22 = scalar_lea.hbm %s1804_s1, 8192 }
   0x4   :  { %s29_s19 = sshll.u32 %s1673_s18, 4  ;;  %p1556_p0 = scmp.ne.s32.totalorder %s1804_s1, %s1555_s22  ;;  %s30_s19 = int_to_ptr.vmem [resolvable:$true] %s29_s19 }
   0x5   :  { %p1559_p1 = scmp.lt.u32.totalorder %s1555_s22, %s1804_s1 }
   0x7   :  { %p1561_p2 = pnand %p1559_p1, %p1556_p0 }
   0x9   :  { %1564 = shalt.err (!%p1561_p2)
}
   0xa   :  { %s1565_s27 = scalar_lea.vmem %s30_s19, 8192  ;;  %p1570_p4 = scmp.lt.s32.totalorder %s30_s19, %s30_s19 }
   0xb   :  { %p1566_p3 = scmp.ne.s32.totalorder %s30_s19, %s1565_s27  ;;  %p1571_p5 = scmp.lt.s32.totalorder %s1565_s27, %s1565_s27 }
   0xd   :  { %p1572_p6 = por %p1571_p5, %p1570_p4 }
   0xf   :  { %p1573_p7 = pnand %p1572_p6, %p1566_p3 }
  0x11   :  { %1576 = shalt.err (!%p1573_p7)
}
  0x12   :  { %s1674_s28 = smov 256   ;;  %s1675_s29 = smov 16  }
  0x13   :  { %35 = dma.hbm_to_vmem [thread:$0]  %s1804_s1, 8192, %s30_s19, [#allocation6], %s1674_s28, %s1674_s28, %s1675_s29  }
  0x14   :  { %s1676_s7 = smov [#allocation2]   ;;  %s1677_s9 = smov [#allocation7]  }
  0x15   :  { %s20_s8 = sshll.u32 %s1676_s7, 4  ;;  %s42_s10 = sshll.u32 %s1677_s9, 4  ;;  %s21_s8 = int_to_ptr.vmem [resolvable:$true] %s20_s8  ;;  %s43_s10 = int_to_ptr.vmem [resolvable:$true] %s42_s10 }
  0x16   :  { %s1577_s13 = scalar_lea.hbm %s1803_s0, 128 }
  0x17   :  { %p1578_p8 = scmp.ne.s32.totalorder %s1803_s0, %s1577_s13  ;;  %p1581_p9 = scmp.lt.u32.totalorder %s1577_s13, %s1803_s0 }
  0x19   :  { %p1583_p10 = pnand %p1581_p9, %p1578_p8 }
  0x1b   :  { %1586 = shalt.err (!%p1583_p10)
}
  0x1c   :  { %s1587_s1 = scalar_lea.vmem %s21_s8, 128  ;;  %p1592_p12 = scmp.lt.s32.totalorder %s21_s8, %s21_s8 }
  0x1d   :  { %p1588_p11 = scmp.ne.s32.totalorder %s21_s8, %s1587_s1  ;;  %p1593_p13 = scmp.lt.s32.totalorder %s1587_s1, %s1587_s1 }
  0x1f   :  { %p1594_p0 = por %p1593_p13, %p1592_p12 }
  0x21   :  { %p1595_p1 = pnand %p1594_p0, %p1588_p11 }
  0x23   :  { %1598 = shalt.err (!%p1595_p1)
}
  0x24   :  { %23 = dma.hbm_to_vmem [thread:$0]  %s1803_s0, 128, %s21_s8, [#allocation3]  }
  0x25   :  { %s1599_s22 = scalar_lea.hbm %s1805_s2, 128 }
  0x26   :  { %p1600_p2 = scmp.ne.s32.totalorder %s1805_s2, %s1599_s22  ;;  %p1603_p3 = scmp.lt.u32.totalorder %s1599_s22, %s1805_s2 }
  0x28   :  { %p1605_p4 = pnand %p1603_p3, %p1600_p2 }
  0x2a   :  { %1608 = shalt.err (!%p1605_p4)
}
  0x2b   :  { %s1609_s27 = scalar_lea.vmem %s43_s10, 128  ;;  %p1614_p6 = scmp.lt.s32.totalorder %s43_s10, %s43_s10 }
  0x2c   :  { %p1610_p5 = scmp.ne.s32.totalorder %s43_s10, %s1609_s27  ;;  %p1615_p7 = scmp.lt.s32.totalorder %s1609_s27, %s1609_s27 }
  0x2e   :  { %p1616_p8 = por %p1615_p7, %p1614_p6 }
  0x30   :  { %p1617_p9 = pnand %p1616_p8, %p1610_p5 }
  0x32   :  { %1620 = shalt.err (!%p1617_p9)
}
  0x33   :  { %45 = dma.hbm_to_vmem [thread:$0]  %s1805_s2, 128, %s43_s10, [#allocation6]  }
  0x34   :  { %s1678_s29 = smov [#allocation8]   ;;  %s1621_s8 = scalar_lea.hbm %s1806_s3, 8192 }
  0x35   :  { %s51_s30 = sshll.u32 %s1678_s29, 4  ;;  %p1622_p10 = scmp.ne.s32.totalorder %s1806_s3, %s1621_s8  ;;  %s52_s30 = int_to_ptr.vmem [resolvable:$true] %s51_s30 }
  0x36   :  { %p1625_p11 = scmp.lt.u32.totalorder %s1621_s8, %s1806_s3 }
  0x38   :  { %p1627_p12 = pnand %p1625_p11, %p1622_p10 }
  0x3a   :  { %1630 = shalt.err (!%p1627_p12)
}
  0x3b   :  { %s1631_s14 = scalar_lea.vmem %s52_s30, 8192  ;;  %p1636_p0 = scmp.lt.s32.totalorder %s52_s30, %s52_s30 }
  0x3c   :  { %p1632_p13 = scmp.ne.s32.totalorder %s52_s30, %s1631_s14  ;;  %p1637_p1 = scmp.lt.s32.totalorder %s1631_s14, %s1631_s14 }
  0x3e   :  { %p1638_p2 = por %p1637_p1, %p1636_p0 }
  0x40   :  { %p1639_p3 = pnand %p1638_p2, %p1632_p13 }
  0x42   :  { %1642 = shalt.err (!%p1639_p3)
}
  0x43   :  { %s1679_s2 = smov 128   ;;  %s1680_s10 = smov 8  }
  0x44   :  { %57 = dma.hbm_to_vmem [thread:$0]  %s1806_s3, 8192, %s52_s30, [#allocation9], %s1679_s2, %s1679_s2, %s1680_s10  }
  0x45   :  { %1665 = dma.done.wait [#allocation3], 128  }
  0x46   :  { %1666 = vsyncadd [#allocation3], 4294967168 }
  0x47   :  { %1667 = dma.done.wait [#allocation6], 8320  }
  0x48   :  { %1668 = vsyncadd [#allocation6], 4294958976 }
  0x49   :  { %1669 = dma.done.wait [#allocation9], 8192  }
  0x4a   :  { %1670 = vsyncadd [#allocation9], 4294959104  ;;  %v1353_v0 = vld [vmem:[#allocation5 + $0x4] ss:$16 sps:$4 sm:$0xff]   ;;  %v1355_v1 = vld [vmem:[#allocation5] ss:$16 sps:$4 sm:$0xff]  }
  0x4b   :  { %464 = vmatprep.subr.bf16.mxu1 %v1353_v0  ;;  %v1356_v2 = vld [vmem:[#allocation5 + $0x24] ss:$16 sps:$4 sm:$0xff]   ;;  %v1358_v3 = vld [vmem:[#allocation5 + $0x20] ss:$16 sps:$4 sm:$0xff]   ;;  %v72_v13 = vld [vmem:[#allocation2] sm:$0xff]  ;;  %s1682_s1 = smov [#allocation10]  }
  0x4c   :  { %465 = vmatpush1.bf16.msra.mxu1 %v1355_v1  ;;  %v1359_v4 = vld [vmem:[#allocation5 + $0x44] ss:$16 sps:$4 sm:$0xff]   ;;  %v1361_v5 = vld [vmem:[#allocation5 + $0x40] ss:$16 sps:$4 sm:$0xff]   ;;  %v1208_v14 = vcombine.high %v72_v13, %v72_v13  ;;  %v1405_v34 = vld [vmem:[#allocation5 + $0xc] ss:$16 sps:$4 sm:$0xff]   ;;  %v1761_v36 = vcombine.low %v72_v13, %v72_v13 }
  0x4d   :  { %466 = vmatprep.subr.bf16.mxu1 %v1356_v2  ;;  %v1362_v6 = vld [vmem:[#allocation5 + $0x64] ss:$16 sps:$4 sm:$0xff]   ;;  %v1364_v7 = vld [vmem:[#allocation5 + $0x60] ss:$16 sps:$4 sm:$0xff]   ;;  %v1403_v35 = vld [vmem:[#allocation5 + $0x8] ss:$16 sps:$4 sm:$0xff]  }
  0x4e   :  { %v1365_v8 = vld [vmem:[#allocation5 + $0x84] ss:$16 sps:$4 sm:$0xff]   ;;  %v1367_v9 = vld [vmem:[#allocation5 + $0x80] ss:$16 sps:$4 sm:$0xff]   ;;  %496 = vmatprep.mubr.bf16.mxu1 %v1208_v14  ;;  %v1408_v37 = vld [vmem:[#allocation5 + $0x2c] ss:$16 sps:$4 sm:$0xff]  }
  0x4f   :  { %v1368_v10 = vld [vmem:[#allocation5 + $0xa4] ss:$16 sps:$4 sm:$0xff]   ;;  %v1370_v11 = vld [vmem:[#allocation5 + $0xa0] ss:$16 sps:$4 sm:$0xff]   ;;  %v1406_v38 = vld [vmem:[#allocation5 + $0x28] ss:$16 sps:$4 sm:$0xff]  }
  0x50   :  { %467 = vmatpush1.bf16.msra.mxu1 %v1358_v3  ;;  %v1371_v12 = vld [vmem:[#allocation5 + $0xc4] ss:$16 sps:$4 sm:$0xff]   ;;  %v1373_v15 = vld [vmem:[#allocation5 + $0xc0] ss:$16 sps:$4 sm:$0xff]   ;;  %v1411_v39 = vld [vmem:[#allocation5 + $0x4c] ss:$16 sps:$4 sm:$0xff]  }
  0x51   :  { %468 = vmatprep.subr.bf16.mxu1 %v1359_v4  ;;  %v1374_v16 = vld [vmem:[#allocation5 + $0xe4] ss:$16 sps:$4 sm:$0xff]   ;;  %v1376_v17 = vld [vmem:[#allocation5 + $0xe0] ss:$16 sps:$4 sm:$0xff]   ;;  %v1409_v40 = vld [vmem:[#allocation5 + $0x48] ss:$16 sps:$4 sm:$0xff]  }
  0x52   :  { %v1377_v18 = vld [vmem:[#allocation5 + $0x104] ss:$16 sps:$4 sm:$0xff]   ;;  %v1379_v19 = vld [vmem:[#allocation5 + $0x100] ss:$16 sps:$4 sm:$0xff]   ;;  %v1414_v41 = vld [vmem:[#allocation5 + $0x6c] ss:$16 sps:$4 sm:$0xff]  }
  0x53   :  { %v1380_v20 = vld [vmem:[#allocation5 + $0x124] ss:$16 sps:$4 sm:$0xff]   ;;  %v1382_v21 = vld [vmem:[#allocation5 + $0x120] ss:$16 sps:$4 sm:$0xff]   ;;  %v1412_v42 = vld [vmem:[#allocation5 + $0x68] ss:$16 sps:$4 sm:$0xff]  }
  0x54   :  { %469 = vmatpush1.bf16.msra.mxu1 %v1361_v5  ;;  %v1383_v22 = vld [vmem:[#allocation5 + $0x144] ss:$16 sps:$4 sm:$0xff]   ;;  %v1385_v23 = vld [vmem:[#allocation5 + $0x140] ss:$16 sps:$4 sm:$0xff]   ;;  %v1417_v43 = vld [vmem:[#allocation5 + $0x8c] ss:$16 sps:$4 sm:$0xff]  }
  0x55   :  { %470 = vmatprep.subr.bf16.mxu1 %v1362_v6  ;;  %v1386_v24 = vld [vmem:[#allocation5 + $0x164] ss:$16 sps:$4 sm:$0xff]   ;;  %v1388_v25 = vld [vmem:[#allocation5 + $0x160] ss:$16 sps:$4 sm:$0xff]   ;;  %v1415_v44 = vld [vmem:[#allocation5 + $0x88] ss:$16 sps:$4 sm:$0xff]  }
  0x56   :  { %v1389_v26 = vld [vmem:[#allocation5 + $0x184] ss:$16 sps:$4 sm:$0xff]   ;;  %v1391_v27 = vld [vmem:[#allocation5 + $0x180] ss:$16 sps:$4 sm:$0xff]   ;;  %v1420_v45 = vld [vmem:[#allocation5 + $0xac] ss:$16 sps:$4 sm:$0xff]  }
  0x57   :  { %v1392_v28 = vld [vmem:[#allocation5 + $0x1a4] ss:$16 sps:$4 sm:$0xff]   ;;  %v1394_v29 = vld [vmem:[#allocation5 + $0x1a0] ss:$16 sps:$4 sm:$0xff]   ;;  %v1418_v46 = vld [vmem:[#allocation5 + $0xa8] ss:$16 sps:$4 sm:$0xff]  }
  0x58   :  { %471 = vmatpush1.bf16.msra.mxu1 %v1364_v7  ;;  %v1395_v30 = vld [vmem:[#allocation5 + $0x1c4] ss:$16 sps:$4 sm:$0xff]   ;;  %v1397_v31 = vld [vmem:[#allocation5 + $0x1c0] ss:$16 sps:$4 sm:$0xff]   ;;  %v1423_v47 = vld [vmem:[#allocation5 + $0xcc] ss:$16 sps:$4 sm:$0xff]  }
  0x59   :  { %472 = vmatprep.subr.bf16.mxu1 %v1365_v8  ;;  %v1398_v32 = vld [vmem:[#allocation5 + $0x1e4] ss:$16 sps:$4 sm:$0xff]   ;;  %v1400_v33 = vld [vmem:[#allocation5 + $0x1e0] ss:$16 sps:$4 sm:$0xff]   ;;  %v1421_v48 = vld [vmem:[#allocation5 + $0xc8] ss:$16 sps:$4 sm:$0xff]  }
  0x5a   :  { %v1426_v49 = vld [vmem:[#allocation5 + $0xec] ss:$16 sps:$4 sm:$0xff]   ;;  %v1424_v50 = vld [vmem:[#allocation5 + $0xe8] ss:$16 sps:$4 sm:$0xff]   ;;  %s1196_s18 = sshll.u32 %s1682_s1, 4  ;;  %s1197_s18 = int_to_ptr.vmem [resolvable:$true] %s1196_s18 }
  0x5b   :  { %v1429_v51 = vld [vmem:[#allocation5 + $0x10c] ss:$16 sps:$4 sm:$0xff]   ;;  %v1427_v52 = vld [vmem:[#allocation5 + $0x108] ss:$16 sps:$4 sm:$0xff]   ;;  %s1643_s19 = scalar_lea.vmem %s1197_s18, 256  ;;  %p1648_p5 = scmp.lt.s32.totalorder %s1197_s18, %s1197_s18 }
  0x5c   :  { %473 = vmatpush1.bf16.msra.mxu1 %v1367_v9  ;;  %v1432_v53 = vld [vmem:[#allocation5 + $0x12c] ss:$16 sps:$4 sm:$0xff]   ;;  %v1430_v54 = vld [vmem:[#allocation5 + $0x128] ss:$16 sps:$4 sm:$0xff]   ;;  %p1644_p4 = scmp.ne.s32.totalorder %s1197_s18, %s1643_s19  ;;  %p1649_p6 = scmp.lt.s32.totalorder %s1643_s19, %s1643_s19 }
  0x5d   :  { %474 = vmatprep.subr.bf16.mxu1 %v1368_v10  ;;  %v1435_v55 = vld [vmem:[#allocation5 + $0x14c] ss:$16 sps:$4 sm:$0xff]   ;;  %v1433_v56 = vld [vmem:[#allocation5 + $0x148] ss:$16 sps:$4 sm:$0xff]  }
  0x5e   :  { %v1438_v57 = vld [vmem:[#allocation5 + $0x16c] ss:$16 sps:$4 sm:$0xff]   ;;  %v1436_v58 = vld [vmem:[#allocation5 + $0x168] ss:$16 sps:$4 sm:$0xff]   ;;  %p1650_p7 = por %p1649_p6, %p1648_p5 }
  0x5f   :  { %v1441_v59 = vld [vmem:[#allocation5 + $0x18c] ss:$16 sps:$4 sm:$0xff]   ;;  %v1439_v60 = vld [vmem:[#allocation5 + $0x188] ss:$16 sps:$4 sm:$0xff]  }
  0x60   :  { %475 = vmatpush1.bf16.msra.mxu1 %v1370_v11  ;;  %v1444_v61 = vld [vmem:[#allocation5 + $0x1ac] ss:$16 sps:$4 sm:$0xff]   ;;  %v1442_v62 = vld [vmem:[#allocation5 + $0x1a8] ss:$16 sps:$4 sm:$0xff]   ;;  %p1651_p8 = pnand %p1650_p7, %p1644_p4 }
  0x61   :  { %476 = vmatprep.subr.bf16.mxu1 %v1371_v12  ;;  %v1447_v63 = vld [vmem:[#allocation5 + $0x1cc] ss:$16 sps:$4 sm:$0xff]   ;;  %v1445_v0 = vld [vmem:[#allocation5 + $0x1c8] ss:$16 sps:$4 sm:$0xff]  }
  0x62   :  { %v1450_v1 = vld [vmem:[#allocation5 + $0x1ec] ss:$16 sps:$4 sm:$0xff]   ;;  %v1448_v2 = vld [vmem:[#allocation5 + $0x1e8] ss:$16 sps:$4 sm:$0xff]  }
  0x63   :  { %v1451_v3 = vld [vmem:[#allocation8 + $0x4] ss:$8 sps:$4 sm:$0xff]   ;;  %v1453_v4 = vld [vmem:[#allocation8] ss:$8 sps:$4 sm:$0xff]   ;;  %v1454_v5 = vld [vmem:[#allocation8 + $0x14] ss:$8 sps:$4 sm:$0xff]  }
  0x64   :  { %477 = vmatpush1.bf16.msra.mxu1 %v1373_v15  ;;  %1106 = vmatprep.subr.bf16.mxu0 %v1451_v3  ;;  %v1456_v6 = vld [vmem:[#allocation8 + $0x10] ss:$8 sps:$4 sm:$0xff]   ;;  %v1457_v7 = vld [vmem:[#allocation8 + $0x24] ss:$8 sps:$4 sm:$0xff]   ;;  %v1459_v8 = vld [vmem:[#allocation8 + $0x20] ss:$8 sps:$4 sm:$0xff]  }
  0x65   :  { %478 = vmatprep.subr.bf16.mxu1 %v1374_v16  ;;  %1107 = vmatpush1.bf16.msra.mxu0 %v1453_v4  ;;  %v1460_v9 = vld [vmem:[#allocation8 + $0x34] ss:$8 sps:$4 sm:$0xff]   ;;  %v1462_v10 = vld [vmem:[#allocation8 + $0x30] ss:$8 sps:$4 sm:$0xff]   ;;  %v1463_v11 = vld [vmem:[#allocation8 + $0x44] ss:$8 sps:$4 sm:$0xff]  }
  0x66   :  { %1108 = vmatprep.subr.bf16.mxu0 %v1454_v5  ;;  %v1465_v12 = vld [vmem:[#allocation8 + $0x40] ss:$8 sps:$4 sm:$0xff]   ;;  %v1466_v13 = vld [vmem:[#allocation8 + $0x54] ss:$8 sps:$4 sm:$0xff]   ;;  %v1469_v15 = vld [vmem:[#allocation8 + $0x64] ss:$8 sps:$4 sm:$0xff]  }
  0x67   :  { %v1471_v16 = vld [vmem:[#allocation8 + $0x60] ss:$8 sps:$4 sm:$0xff]  }
  0x68   :  { %479 = vmatpush1.bf16.msra.mxu1 %v1376_v17  ;;  %v1472_v17 = vld [vmem:[#allocation8 + $0x74] ss:$8 sps:$4 sm:$0xff]  }
  0x69   :  { %480 = vmatprep.subr.bf16.mxu1 %v1377_v18  ;;  %1109 = vmatpush1.bf16.msra.mxu0 %v1456_v6  ;;  %v1474_v18 = vld [vmem:[#allocation8 + $0x70] ss:$8 sps:$4 sm:$0xff]  }
  0x6a   :  { %1110 = vmatprep.subr.bf16.mxu0 %v1457_v7 }
  0x6c   :  { %481 = vmatpush1.bf16.msra.mxu1 %v1379_v19  ;;  %v1475_v19 = vld [vmem:[#allocation8 + $0x84] ss:$8 sps:$4 sm:$0xff]  }
  0x6d   :  { %482 = vmatprep.subr.bf16.mxu1 %v1380_v20  ;;  %1111 = vmatpush1.bf16.msra.mxu0 %v1459_v8  ;;  %v1477_v20 = vld [vmem:[#allocation8 + $0x80] ss:$8 sps:$4 sm:$0xff]  }
  0x6e   :  { %1112 = vmatprep.subr.bf16.mxu0 %v1460_v9 }
  0x70   :  { %483 = vmatpush1.bf16.msra.mxu1 %v1382_v21  ;;  %v1478_v21 = vld [vmem:[#allocation8 + $0x94] ss:$8 sps:$4 sm:$0xff]  }
  0x71   :  { %484 = vmatprep.subr.bf16.mxu1 %v1383_v22  ;;  %1113 = vmatpush1.bf16.msra.mxu0 %v1462_v10  ;;  %v1480_v22 = vld [vmem:[#allocation8 + $0x90] ss:$8 sps:$4 sm:$0xff]  }
  0x72   :  { %1114 = vmatprep.subr.bf16.mxu0 %v1463_v11 }
  0x74   :  { %485 = vmatpush1.bf16.msra.mxu1 %v1385_v23  ;;  %v1481_v23 = vld [vmem:[#allocation8 + $0xa4] ss:$8 sps:$4 sm:$0xff]  }
  0x75   :  { %486 = vmatprep.subr.bf16.mxu1 %v1386_v24  ;;  %1115 = vmatpush1.bf16.msra.mxu0 %v1465_v12  ;;  %v1483_v24 = vld [vmem:[#allocation8 + $0xa0] ss:$8 sps:$4 sm:$0xff]  }
  0x76   :  { %1116 = vmatprep.subr.bf16.mxu0 %v1466_v13 }
  0x78   :  { %487 = vmatpush1.bf16.msra.mxu1 %v1388_v25  ;;  %v1484_v25 = vld [vmem:[#allocation8 + $0xb4] ss:$8 sps:$4 sm:$0xff]  }
  0x79   :  { %488 = vmatprep.subr.bf16.mxu1 %v1389_v26  ;;  %v1486_v26 = vld [vmem:[#allocation8 + $0xb0] ss:$8 sps:$4 sm:$0xff]  }
  0x7c   :  { %489 = vmatpush1.bf16.msra.mxu1 %v1391_v27  ;;  %v1487_v27 = vld [vmem:[#allocation8 + $0xc4] ss:$8 sps:$4 sm:$0xff]  }
  0x7d   :  { %490 = vmatprep.subr.bf16.mxu1 %v1392_v28  ;;  %v1489_v28 = vld [vmem:[#allocation8 + $0xc0] ss:$8 sps:$4 sm:$0xff]  }
  0x80   :  { %491 = vmatpush1.bf16.msra.mxu1 %v1394_v29  ;;  %v1490_v29 = vld [vmem:[#allocation8 + $0xd4] ss:$8 sps:$4 sm:$0xff]  }
  0x81   :  { %492 = vmatprep.subr.bf16.mxu1 %v1395_v30  ;;  %v1492_v30 = vld [vmem:[#allocation8 + $0xd0] ss:$8 sps:$4 sm:$0xff]  }
  0x84   :  { %493 = vmatpush1.bf16.msra.mxu1 %v1397_v31  ;;  %v1493_v31 = vld [vmem:[#allocation8 + $0xe4] ss:$8 sps:$4 sm:$0xff]  }
  0x85   :  { %494 = vmatprep.subr.bf16.mxu1 %v1398_v32  ;;  %v1495_v32 = vld [vmem:[#allocation8 + $0xe0] ss:$8 sps:$4 sm:$0xff]  }
  0x88   :  { %495 = vmatpush1.bf16.msra.mxu1 %v1400_v33  ;;  %v1496_v33 = vld [vmem:[#allocation8 + $0xf4] ss:$8 sps:$4 sm:$0xff]  }
  0x89   :  { %505 = vmatprep.subr.bf16.mxu1 %v1405_v34  ;;  %v1498_v34 = vld [vmem:[#allocation8 + $0xf0] ss:$8 sps:$4 sm:$0xff]  }
  0x8b   :  { %497 = vmatmul.mubr.bf16.vlgmr.msra.gmra.mrb[0].mxu1 %v1761_v36 }
  0x8c   :  { %506 = vmatpush1.bf16.msra.mxu1 %v1403_v35  ;;  %537 = vmatprep.mubr.bf16.mxu1 %v1208_v14  ;;  %v1468_v14 = vld [vmem:[#allocation8 + $0x50] ss:$8 sps:$4 sm:$0xff]  }
  0x8d   :  { %507 = vmatprep.subr.bf16.mxu1 %v1408_v37  ;;  %1117 = vmatpush1.bf16.msra.mxu0 %v1468_v14 }
  0x8e   :  { %1118 = vmatprep.subr.bf16.mxu0 %v1469_v15 }
  0x90   :  { %508 = vmatpush1.bf16.msra.mxu1 %v1406_v38  ;;  %v1501_v38 = vld [vmem:[#allocation8 + $0x104] ss:$8 sps:$4 sm:$0xff]  }
  0x91   :  { %509 = vmatprep.subr.bf16.mxu1 %v1411_v39  ;;  %1119 = vmatpush1.bf16.msra.mxu0 %v1471_v16 }
  0x92   :  { %1120 = vmatprep.subr.bf16.mxu0 %v1472_v17 }
  0x94   :  { %510 = vmatpush1.bf16.msra.mxu1 %v1409_v40 }
  0x95   :  { %511 = vmatprep.subr.bf16.mxu1 %v1414_v41  ;;  %1121 = vmatpush1.bf16.msra.mxu0 %v1474_v18 }
  0x96   :  { %1122 = vmatprep.subr.bf16.mxu0 %v1475_v19 }
  0x98   :  { %512 = vmatpush1.bf16.msra.mxu1 %v1412_v42 }
  0x99   :  { %513 = vmatprep.subr.bf16.mxu1 %v1417_v43  ;;  %1123 = vmatpush1.bf16.msra.mxu0 %v1477_v20 }
  0x9a   :  { %1124 = vmatprep.subr.bf16.mxu0 %v1478_v21 }
  0x9c   :  { %514 = vmatpush1.bf16.msra.mxu1 %v1415_v44 }
  0x9d   :  { %515 = vmatprep.subr.bf16.mxu1 %v1420_v45  ;;  %1125 = vmatpush1.bf16.msra.mxu0 %v1480_v22 }
  0x9e   :  { %1126 = vmatprep.subr.bf16.mxu0 %v1481_v23 }
  0xa0   :  { %516 = vmatpush1.bf16.msra.mxu1 %v1418_v46 }
  0xa1   :  { %517 = vmatprep.subr.bf16.mxu1 %v1423_v47  ;;  %1127 = vmatpush1.bf16.msra.mxu0 %v1483_v24 }
  0xa2   :  { %1128 = vmatprep.subr.bf16.mxu0 %v1484_v25 }
  0xa4   :  { %518 = vmatpush1.bf16.msra.mxu1 %v1421_v48 }
  0xa5   :  { %519 = vmatprep.subr.bf16.mxu1 %v1426_v49  ;;  %1129 = vmatpush1.bf16.msra.mxu0 %v1486_v26 }
  0xa6   :  { %1130 = vmatprep.subr.bf16.mxu0 %v1487_v27 }
  0xa8   :  { %520 = vmatpush1.bf16.msra.mxu1 %v1424_v50 }
  0xa9   :  { %521 = vmatprep.subr.bf16.mxu1 %v1429_v51  ;;  %1131 = vmatpush1.bf16.msra.mxu0 %v1489_v28 }
  0xaa   :  { %1132 = vmatprep.subr.bf16.mxu0 %v1490_v29 }
  0xac   :  { %522 = vmatpush1.bf16.msra.mxu1 %v1427_v52 }
  0xad   :  { %523 = vmatprep.subr.bf16.mxu1 %v1432_v53  ;;  %1133 = vmatpush1.bf16.msra.mxu0 %v1492_v30 }
  0xae   :  { %1134 = vmatprep.subr.bf16.mxu0 %v1493_v31 }
  0xb0   :  { %524 = vmatpush1.bf16.msra.mxu1 %v1430_v54 }
  0xb1   :  { %525 = vmatprep.subr.bf16.mxu1 %v1435_v55  ;;  %1135 = vmatpush1.bf16.msra.mxu0 %v1495_v32 }
  0xb2   :  { %1136 = vmatprep.subr.bf16.mxu0 %v1496_v33 }
  0xb4   :  { %526 = vmatpush1.bf16.msra.mxu1 %v1433_v56 }
  0xb5   :  { %527 = vmatprep.subr.bf16.mxu1 %v1438_v57  ;;  %1137 = vmatpush1.bf16.msra.mxu0 %v1498_v34 }
  0xb6   :  { %1147 = vmatprep.subr.bf16.mxu0 %v1501_v38 }
  0xb8   :  { %528 = vmatpush1.bf16.msra.mxu1 %v1436_v58 }
  0xb9   :  { %529 = vmatprep.subr.bf16.mxu1 %v1441_v59 }
  0xbc   :  { %530 = vmatpush1.bf16.msra.mxu1 %v1439_v60 }
  0xbd   :  { %531 = vmatprep.subr.bf16.mxu1 %v1444_v61 }
  0xc0   :  { %532 = vmatpush1.bf16.msra.mxu1 %v1442_v62 }
  0xc1   :  { %533 = vmatprep.subr.bf16.mxu1 %v1447_v63 }
  0xc4   :  { %534 = vmatpush1.bf16.msra.mxu1 %v1445_v0 }
  0xc5   :  { %535 = vmatprep.subr.bf16.mxu1 %v1450_v1 }
  0xc8   :  { %536 = vmatpush1.bf16.msra.mxu1 %v1448_v2 }
  0xcb   :  { %538 = vmatmul.mubr.bf16.vlgmr.msra.gmra.mrb[4].mxu1 %v1761_v36 }
 0x15e   :  { %v498_v35 = vpop.f32.mrb[0].mxu1 }
 0x15f   :  { %v546_v36 = vrot.slane %v498_v35, 4  ;;  %v500_v37 = vpop.f32.mrb[1].mxu1 }
 0x160   :  { %v552_v39 = vrot.slane %v500_v37, 4  ;;  %v502_v40 = vpop.f32.mrb[2].mxu1 }
 0x161   :  { %v547_v41 = vadd.f32 %v546_v36, %v498_v35  ;;  %v503_v42 = vpop.f32.mrb[3].mxu1 }
 0x162   :  { %v553_v43 = vadd.f32 %v552_v39, %v500_v37 }
 0x163   :  { %v548_v44 = vrot.slane %v547_v41, 2 }
 0x164   :  { %v554_v45 = vrot.slane %v553_v43, 2 }
 0x165   :  { %v549_v46 = vadd.f32 %v548_v44, %v547_v41 }
 0x166   :  { %v555_v47 = vadd.f32 %v554_v45, %v553_v43 }
 0x167   :  { %v550_v48 = vrot.slane %v549_v46, 1 }
 0x168   :  { %v556_v49 = vrot.slane %v555_v47, 1 }
 0x169   :  { %v551_v50 = vadd.f32 %v550_v48, %v549_v46 }
 0x16a   :  { %v557_v51 = vadd.f32 %v556_v49, %v555_v47 }
 0x16b   :  { %v571_v52 = vmul.f32 0.125, %v551_v50 }
 0x16c   :  { %v572_v53 = vmul.f32 0.125, %v557_v51  ;;  %v1681_v51 = vmov 1966171168  }
 0x16d   :  { %v1765_v54 = vsub.f32 %v498_v35, %v571_v52  ;;  %v627_v52 = vunpack.c.l.s4 %v1681_v51  ;;  %v1532_v51 = vld [vmem:[#allocation8 + $0x1b0] ss:$8 sps:$4 sm:$0xff]  }
 0x16e   :  { %v1767_v55 = vsub.f32 %v500_v37, %v572_v53  ;;  %v629_v53 = vlaneseq }
 0x16f   :  { %v579_v56 = vmul.f32 %v1765_v54, %v1765_v54 }
 0x170   :  { %v580_v57 = vmul.f32 %v1767_v55, %v1767_v55 }
 0x171   :  { %v583_v58 = vrot.slane %v579_v56, 4 }
 0x172   :  { %v589_v59 = vrot.slane %v580_v57, 4 }
 0x173   :  { %v584_v60 = vadd.f32 %v583_v58, %v579_v56  ;;  %v628_v56 = vunpack.c.0.s8 %v627_v52  ;;  %v1537_v52 = vld [vmem:[#allocation8 + $0x1c4] ss:$8 sps:$4 sm:$0xff]  }
 0x174   :  { %v590_v61 = vadd.f32 %v589_v59, %v580_v57  ;;  %v630_v57 = vshrl.u32 %v629_v53, 7  ;;  %v1535_v53 = vld [vmem:[#allocation8 + $0x1c0] ss:$8 sps:$4 sm:$0xff]  }
 0x175   :  { %v585_v62 = vrot.slane %v584_v60, 2 }
 0x176   :  { %v591_v63 = vrot.slane %v590_v61, 2  ;;  %v631_v59 = vsub.s32 %v628_v56, %v630_v57  ;;  %v1540_v56 = vld [vmem:[#allocation8 + $0x1d4] ss:$8 sps:$4 sm:$0xff]  }
 0x177   :  { %v586_v0 = vadd.f32 %v585_v62, %v584_v60 }
 0x178   :  { %v592_v1 = vadd.f32 %v591_v63, %v590_v61 }
 0x179   :  { %v587_v2 = vrot.slane %v586_v0, 1 }
 0x17a   :  { %v593_v3 = vrot.slane %v592_v1, 1 }
 0x17b   :  { %v588_v4 = vadd.f32 %v587_v2, %v586_v0  ;;  %v665_v2 = vsub.s32 3, %v630_v57 }
 0x17c   :  { %v594_v5 = vadd.f32 %v593_v3, %v592_v1  ;;  %v611_v1 = vld [vmem:[#allocation7] ss:$2 sm:$0xf] }
 0x17d   :  { %v607_v6 = vmul.f32 0.125, %v588_v4  ;;  %v1773_v4 = vsub.s32 1, %v630_v57 }
 0x17e   :  { %v608_v7 = vmul.f32 0.125, %v594_v5  ;;  %v676_v5 = vld [vmem:[#allocation7 + $0x1] ss:$2 sm:$0xf] }
 0x17f   :  { %v612_v8 = vadd.f32 1e-05, %v607_v6  ;;  %v1775_v6 = vsub.s32 0, %v630_v57 }
 0x180   :  { %v613_v9 = vadd.f32 1e-05, %v608_v7  ;;  %v661_v7 = vsub.s32 2, %v630_v57  ;;  %v1538_v57 = vld [vmem:[#allocation8 + $0x1d0] ss:$8 sps:$4 sm:$0xff]  }
 0x181   :  { %1547 = vrsqrt.f32 %v612_v8 }
 0x182   :  { %1549 = vrsqrt.f32 %v613_v9  ;;  %v685_v9 = vrot.slane %v676_v5, %v1773_v4 }
 0x18b   :  { %v1548_v10 = vpop.eup %1547 }
 0x18c   :  { %v1550_v11 = vpop.eup %1549 }
 0x18d   :  { %v624_v12 = vcombine.low %v1548_v10, %v1550_v11  ;;  %v681_v10 = vrot.slane %v676_v5, %v1775_v6  ;;  %v693_v11 = vrot.slane %v676_v5, %v665_v2 }
 0x18f   :  { %v632_v62 = vrot.slane %v624_v12, %v631_v59 }
 0x19e   :  { %v539_v13 = vpop.f32.mrb[4].mxu1 }
 0x19f   :  { %v558_v14 = vrot.slane %v539_v13, 4  ;;  %v541_v15 = vpop.f32.mrb[5].mxu1 }
 0x1a0   :  { %v564_v16 = vrot.slane %v541_v15, 4  ;;  %v543_v17 = vpop.f32.mrb[6].mxu1 }
 0x1a1   :  { %v559_v18 = vadd.f32 %v558_v14, %v539_v13  ;;  %v544_v19 = vpop.f32.mrb[7].mxu1 }
 0x1a2   :  { %v565_v20 = vadd.f32 %v564_v16, %v541_v15 }
 0x1a3   :  { %v560_v21 = vrot.slane %v559_v18, 2 }
 0x1a4   :  { %v566_v22 = vrot.slane %v565_v20, 2 }
 0x1a5   :  { %v561_v23 = vadd.f32 %v560_v21, %v559_v18 }
 0x1a6   :  { %v567_v24 = vadd.f32 %v566_v22, %v565_v20 }
 0x1a7   :  { %v562_v25 = vrot.slane %v561_v23, 1 }
 0x1a8   :  { %v568_v26 = vrot.slane %v567_v24, 1 }
 0x1a9   :  { %v563_v27 = vadd.f32 %v562_v25, %v561_v23 }
 0x1aa   :  { %v569_v28 = vadd.f32 %v568_v26, %v567_v24 }
 0x1ab   :  { %v573_v29 = vmul.f32 0.125, %v563_v27 }
 0x1ac   :  { %v574_v30 = vmul.f32 0.125, %v569_v28 }
 0x1ad   :  { %v577_v31 = vsub.f32 %v539_v13, %v573_v29  ;;  %v689_v13 = vrot.slane %v676_v5, %v661_v7  ;;  %v1499_v29 = vld [vmem:[#allocation8 + $0x100] ss:$8 sps:$4 sm:$0xff]  }
 0x1ae   :  { %v578_v32 = vsub.f32 %v541_v15, %v574_v30 }
 0x1af   :  { %v581_v33 = vmul.f32 %v577_v31, %v577_v31 }
 0x1b0   :  { %v582_v34 = vmul.f32 %v578_v32, %v578_v32 }
 0x1b1   :  { %v595_v35 = vrot.slane %v581_v33, 4 }
 0x1b2   :  { %v601_v36 = vrot.slane %v582_v34, 4 }
 0x1b3   :  { %v596_v37 = vadd.f32 %v595_v35, %v581_v33  ;;  %v1504_v33 = vld [vmem:[#allocation8 + $0x114] ss:$8 sps:$4 sm:$0xff]   ;;  %v1508_v35 = vld [vmem:[#allocation8 + $0x130] ss:$8 sps:$4 sm:$0xff]  }
 0x1b4   :  { %v602_v38 = vadd.f32 %v601_v36, %v582_v34  ;;  %v1513_v36 = vld [vmem:[#allocation8 + $0x144] ss:$8 sps:$4 sm:$0xff]  }
 0x1b5   :  { %v597_v39 = vrot.slane %v596_v37, 2 }
 0x1b6   :  { %v603_v40 = vrot.slane %v602_v38, 2 }
 0x1b7   :  { %v598_v41 = vadd.f32 %v597_v39, %v596_v37  ;;  %v1511_v37 = vld [vmem:[#allocation8 + $0x140] ss:$8 sps:$4 sm:$0xff]   ;;  %v1514_v39 = vld [vmem:[#allocation8 + $0x150] ss:$8 sps:$4 sm:$0xff]  }
 0x1b8   :  { %v604_v42 = vadd.f32 %v603_v40, %v602_v38  ;;  %v1516_v38 = vld [vmem:[#allocation8 + $0x154] ss:$8 sps:$4 sm:$0xff]   ;;  %v1519_v40 = vld [vmem:[#allocation8 + $0x164] ss:$8 sps:$4 sm:$0xff]  }
 0x1b9   :  { %v599_v43 = vrot.slane %v598_v41, 1 }
 0x1ba   :  { %v605_v44 = vrot.slane %v604_v42, 1 }
 0x1bb   :  { %v600_v45 = vadd.f32 %v599_v43, %v598_v41  ;;  %v1517_v41 = vld [vmem:[#allocation8 + $0x160] ss:$8 sps:$4 sm:$0xff]   ;;  %v1520_v43 = vld [vmem:[#allocation8 + $0x170] ss:$8 sps:$4 sm:$0xff]  }
 0x1bc   :  { %v606_v46 = vadd.f32 %v605_v44, %v604_v42  ;;  %v1522_v42 = vld [vmem:[#allocation8 + $0x174] ss:$8 sps:$4 sm:$0xff]   ;;  %v1525_v44 = vld [vmem:[#allocation8 + $0x184] ss:$8 sps:$4 sm:$0xff]  }
 0x1bd   :  { %v609_v47 = vmul.f32 0.125, %v600_v45  ;;  %v1523_v45 = vld [vmem:[#allocation8 + $0x180] ss:$8 sps:$4 sm:$0xff]  }
 0x1be   :  { %v610_v48 = vmul.f32 0.125, %v606_v46  ;;  %v1528_v46 = vld [vmem:[#allocation8 + $0x194] ss:$8 sps:$4 sm:$0xff]  }
 0x1bf   :  { %v614_v49 = vadd.f32 1e-05, %v609_v47  ;;  %v1526_v47 = vld [vmem:[#allocation8 + $0x190] ss:$8 sps:$4 sm:$0xff]  }
 0x1c0   :  { %v615_v50 = vadd.f32 1e-05, %v610_v48  ;;  %v1531_v48 = vld [vmem:[#allocation8 + $0x1a4] ss:$8 sps:$4 sm:$0xff]  }
 0x1c1   :  { %1551 = vrsqrt.f32 %v614_v49  ;;  %v1529_v49 = vld [vmem:[#allocation8 + $0x1a0] ss:$8 sps:$4 sm:$0xff]  }
 0x1c2   :  { %1553 = vrsqrt.f32 %v615_v50  ;;  %v1534_v50 = vld [vmem:[#allocation8 + $0x1b4] ss:$8 sps:$4 sm:$0xff]  }
 0x1cb   :  { %v1552_v58 = vpop.eup %1551 }
 0x1cc   :  { %v1554_v60 = vpop.eup %1553 }
 0x1cd   :  { %v625_v61 = vcombine.low %v1552_v58, %v1554_v60  ;;  %v1543_v58 = vld [vmem:[#allocation8 + $0x1e4] ss:$8 sps:$4 sm:$0xff]   ;;  %v1546_v60 = vld [vmem:[#allocation8 + $0x1f4] ss:$8 sps:$4 sm:$0xff]  }
 0x1cf   :  { %v639_v63 = vrot.slane %v625_v61, %v631_v59  ;;  %v1544_v61 = vld [vmem:[#allocation8 + $0x1f0] ss:$8 sps:$4 sm:$0xff]  }
 0x1d1   :  { %v640_v0 = vcombine.low %v632_v62, %v639_v63 }
 0x1d3   :  { %v647_v3 = vrot.slane %v640_v0, %v631_v59  ;;  %v1541_v59 = vld [vmem:[#allocation8 + $0x1e0] ss:$8 sps:$4 sm:$0xff]   ;;  %v774_v0 = vld [vmem:[%s1807_s4] sm:$0x3] }
 0x1d5   :  { %v649_v8 = vmul.f32 %v647_v3, %v611_v1  ;;  %v779_v1 = vrot.slane %v774_v0, %v1775_v6 }
 0x1d7   :  { %v666_v14 = vrot.slane %v649_v8, %v665_v2  ;;  %v658_v12 = vrot.slane %v649_v8, %v1773_v4  ;;  %v654_v15 = vrot.slane %v649_v8, %v1775_v6  ;;  %v662_v16 = vrot.slane %v649_v8, %v661_v7 }
 0x1d8   :  { %v783_v2 = vrot.slane %v774_v0, %v1773_v4 }
 0x1d9   :  { %v674_v17 = vmul.f32 %v666_v14, %v578_v32  ;;  %v672_v18 = vmul.f32 %v658_v12, %v1767_v55  ;;  %v671_v19 = vmul.f32 %v654_v15, %v1765_v54  ;;  %v673_v20 = vmul.f32 %v662_v16, %v577_v31  ;;  %v1502_v55 = vld [vmem:[#allocation8 + $0x110] ss:$8 sps:$4 sm:$0xff]   ;;  %v1507_v54 = vld [vmem:[#allocation8 + $0x124] ss:$8 sps:$4 sm:$0xff]   ;;  %v1505_v31 = vld [vmem:[#allocation8 + $0x120] ss:$8 sps:$4 sm:$0xff]  }
 0x1da   :  { %v1510_v32 = vld [vmem:[#allocation8 + $0x134] ss:$8 sps:$4 sm:$0xff]  }
 0x1db   :  { %v699_v21 = vadd.f32 %v685_v9, %v672_v18  ;;  %v698_v22 = vadd.f32 %v681_v10, %v671_v19  ;;  %v701_v23 = vadd.f32 %v693_v11, %v674_v17  ;;  %v1783_v24 = vadd.f32 %v689_v13, %v673_v20 }
 0x1dd   :  { %v703_v25 = vmax.f32 %v699_v21, 0.0  ;;  %v702_v26 = vmax.f32 %v698_v22, 0.0  ;;  %v705_v27 = vmax.f32 %v701_v23, 0.0  ;;  %v704_v62 = vmax.f32 %v1783_v24, 0.0 }
 0x1df   :  { %v707_v28 = vpack.c.bf16 %v703_v25, %v703_v25  ;;  %v706_v30 = vpack.c.bf16 %v702_v26, %v702_v26  ;;  %v709_v34 = vpack.c.bf16 %v705_v27, %v705_v27  ;;  %v708_v63 = vpack.c.bf16 %v704_v62, %v704_v62 }
 0x1e1   :  { %1138 = vmatprep.mubr.bf16.mxu0 %v707_v28 }
 0x1e2   :  { %1139 = vmatmul.mubr.bf16.vlgmr.msra.gmra.mrb[0].mxu0 %v706_v30 }
 0x1e3   :  { %1148 = vmatpush1.bf16.msra.mxu0 %v1499_v29  ;;  %1179 = vmatprep.mubr.bf16.mxu0 %v709_v34 }
 0x1e4   :  { %1149 = vmatprep.subr.bf16.mxu0 %v1504_v33 }
 0x1e7   :  { %1150 = vmatpush1.bf16.msra.mxu0 %v1502_v55 }
 0x1e8   :  { %1151 = vmatprep.subr.bf16.mxu0 %v1507_v54 }
 0x1eb   :  { %1152 = vmatpush1.bf16.msra.mxu0 %v1505_v31 }
 0x1ec   :  { %1153 = vmatprep.subr.bf16.mxu0 %v1510_v32 }
 0x1ef   :  { %1154 = vmatpush1.bf16.msra.mxu0 %v1508_v35 }
 0x1f0   :  { %1155 = vmatprep.subr.bf16.mxu0 %v1513_v36 }
 0x1f3   :  { %1156 = vmatpush1.bf16.msra.mxu0 %v1511_v37 }
 0x1f4   :  { %1157 = vmatprep.subr.bf16.mxu0 %v1516_v38 }
 0x1f7   :  { %1158 = vmatpush1.bf16.msra.mxu0 %v1514_v39 }
 0x1f8   :  { %1159 = vmatprep.subr.bf16.mxu0 %v1519_v40 }
 0x1fb   :  { %1160 = vmatpush1.bf16.msra.mxu0 %v1517_v41 }
 0x1fc   :  { %1161 = vmatprep.subr.bf16.mxu0 %v1522_v42 }
 0x1ff   :  { %1162 = vmatpush1.bf16.msra.mxu0 %v1520_v43 }
 0x200   :  { %1163 = vmatprep.subr.bf16.mxu0 %v1525_v44 }
 0x203   :  { %1164 = vmatpush1.bf16.msra.mxu0 %v1523_v45 }
 0x204   :  { %1165 = vmatprep.subr.bf16.mxu0 %v1528_v46 }
 0x207   :  { %1166 = vmatpush1.bf16.msra.mxu0 %v1526_v47 }
 0x208   :  { %1167 = vmatprep.subr.bf16.mxu0 %v1531_v48 }
 0x20b   :  { %1168 = vmatpush1.bf16.msra.mxu0 %v1529_v49 }
 0x20c   :  { %1169 = vmatprep.subr.bf16.mxu0 %v1534_v50 }
 0x20f   :  { %1170 = vmatpush1.bf16.msra.mxu0 %v1532_v51 }
 0x210   :  { %1171 = vmatprep.subr.bf16.mxu0 %v1537_v52 }
 0x213   :  { %1172 = vmatpush1.bf16.msra.mxu0 %v1535_v53 }
 0x214   :  { %1173 = vmatprep.subr.bf16.mxu0 %v1540_v56 }
 0x217   :  { %1174 = vmatpush1.bf16.msra.mxu0 %v1538_v57 }
 0x218   :  { %1175 = vmatprep.subr.bf16.mxu0 %v1543_v58 }
 0x21b   :  { %1176 = vmatpush1.bf16.msra.mxu0 %v1541_v59 }
 0x21c   :  { %1177 = vmatprep.subr.bf16.mxu0 %v1546_v60 }
 0x21f   :  { %1178 = vmatpush1.bf16.msra.mxu0 %v1544_v61 }
 0x222   :  { %1180 = vmatmul.mubr.bf16.vlgmr.msra.gmra.mrb[0].mxu0 %v708_v63 }
 0x2f5   :  { %v1181_v3 = vpop.f32.mrb[0].mxu0 }
 0x2f6   :  { %v1337_v5 = vadd.f32 %v1181_v3, %v779_v1  ;;  %v1183_v7 = vpop.f32.mrb[1].mxu0 }
 0x2f7   :  { %v1338_v8 = vadd.f32 %v1183_v7, %v783_v2  ;;  %v1185_v9 = vpop.f32.mrb[2].mxu0 }
 0x2f8   :  { %1188 = vst [vmem:[#allocation10] sm:$0xff] %v1337_v5  ;;  %v1186_v10 = vpop.f32.mrb[3].mxu0 }
 0x2f9   :  { %1189 = vst [vmem:[#allocation10 + $0x8] sm:$0xff] %v1338_v8 }
 0x2fa   :  { %1654 = shalt.err (!%p1651_p8)
}
 0x2fb   :  { %s1655_s21 = scalar_lea.hbm %s1808_s5, 256 }
 0x2fc   :  { %p1656_p9 = scmp.ne.s32.totalorder %s1808_s5, %s1655_s21  ;;  %p1659_p10 = scmp.lt.u32.totalorder %s1655_s21, %s1808_s5 }
 0x2fe   :  { %p1661_p11 = pnand %p1659_p10, %p1656_p9 }
 0x300   :  { %1664 = shalt.err (!%p1661_p11)
}
 0x301   :  { %1199 = dma.vmem_to_hbm [thread:$0]  %s1197_s18, 256, %s1808_s5, [#allocation4]  }
 0x302   :  { %1671 = dma.done.wait [#allocation4], 256  }
 0x303   :  { %1672 = vsyncadd [#allocation4], 4294967040 }
 0x304   :  { %1203 = vsyncpa [#allocation3], 1 }
 0x305   :  { %1204 = vsyncpa [#allocation6], 1 }
 0x306   :  { %1205 = vsyncpa [#allocation9], 1 }
 0x307   :  { %1206 = vsyncpa [#allocation4], 1 }

</bundles_post_ra>
